<compile_context>
chip_gen: v7x
topology: tpu7x:2x2x1
jax: 0.10.0
libtpu: 0.0.40
codegen_flags: <defaults>
</compile_context>

<pallas_src>
import functools
import math

import jax
import jax.numpy as jnp
from jax.experimental import pallas as pl
from jax.experimental.pallas import tpu as pltpu

_VMEM_LIMIT = 48 * 1024 * 1024  # safe on v5e/v6e (128 MiB) and v7x (64 MiB physical)


# ------------------------------- helpers ------------------------------------

def _round_up(x, m):
    return ((x + m - 1) // m) * m


def _pick_tile(n, candidates):
    for c in candidates:
        if c <= n and n % c == 0:
            return c
    return n  # full extent always satisfies the (8,128) rule


def _pad2(a, r, c):
    return jnp.pad(a, ((0, r - a.shape[0]), (0, c - a.shape[1])))


def _pad1(a, c):
    return jnp.pad(a, (0, c - a.shape[0]))


# ----------------------------- Pallas kernels -------------------------------

def linear_kernel(x_ref, w_ref, b_ref, o_ref, *, relu):
    y = jnp.dot(x_ref[...], w_ref[...], preferred_element_type=jnp.float32)
    y = y + b_ref[...]                       # b is (1, out_features), broadcasts over rows
    if relu:
        y = jnp.maximum(y, 0.0)
    o_ref[...] = y


def gcn_layer_kernel(adj_ref, hk_ref, hres_ref, h0_ref, w_ref, o_ref, acc_ref):
    # acc = adj' @ H   accumulated over the K grid axis (f32 accumulator in VMEM scratch).
    k = pl.program_id(1)

    @pl.when(k == 0)
    def _():
        acc_ref[...] = jnp.zeros_like(acc_ref)

    acc_ref[...] += jnp.dot(adj_ref[...], hk_ref[...],
                            preferred_element_type=jnp.float32)

    # Epilogue once per output row tile:  relu( (acc + alpha*h0) @ W' + H )
    @pl.when(k == pl.num_programs(1) - 1)
    def _():
        support = acc_ref[...] + h0_ref[...]                       # f32
        out = jnp.dot(support.astype(jnp.bfloat16), w_ref[...],
                      preferred_element_type=jnp.float32)
        out = out + hres_ref[...]                                  # residual (f32)
        o_ref[...] = jnp.maximum(out, 0.0)                         # fused ReLU


# ------------------------------- wrappers ------------------------------------

def linear(x, w, b, relu=False):
    n, f_in = x.shape
    f_out = w.shape[1]
    tm = _pick_tile(n, (512, 256, 128))
    b2 = b.reshape(1, f_out)
    return pl.pallas_call(
        functools.partial(linear_kernel, relu=relu),
        out_shape=jax.ShapeDtypeStruct((n, f_out), jnp.float32),
        grid=(n // tm,),
        in_specs=[
            pl.BlockSpec((tm, f_in), lambda i: (i, 0)),
            pl.BlockSpec((f_in, f_out), lambda i: (0, 0)),
            pl.BlockSpec((1, f_out), lambda i: (0, 0)),
        ],
        out_specs=pl.BlockSpec((tm, f_out), lambda i: (i, 0)),
        compiler_params=pltpu.CompilerParams(
            dimension_semantics=("parallel",),
            vmem_limit_bytes=_VMEM_LIMIT,
        ),
    )(x, w, b2)


def gcn_layer(h, adj_s, h0_s, w_prime):
    """One GCNII layer.  adj_s = (1-alpha)*adj (bf16), h0_s = alpha*h0 (f32),
    w_prime = theta*W + (1-theta)*I (bf16)."""
    n, f = h.shape
    tm = _pick_tile(n, (512, 256, 128))       # output-row tile (sublane axis)
    tk = _pick_tile(n, (1024, 512, 256, 128)) # reduction tile (lane axis of adj)
    h_bf16 = h.astype(jnp.bfloat16)           # stream operand for the adj matmul

    return pl.pallas_call(
        gcn_layer_kernel,
        out_shape=jax.ShapeDtypeStruct((n, f), jnp.float32),
        grid=(n // tm, n // tk),
        in_specs=[
            pl.BlockSpec((tm, tk), lambda i, k: (i, k)),   # adj' tile   (streamed, bf16)
            pl.BlockSpec((tk, f), lambda i, k: (k, 0)),    # H (matmul)  (streamed, bf16)
            pl.BlockSpec((tm, f), lambda i, k: (i, 0)),    # H (residual) -- resident per row tile
            pl.BlockSpec((tm, f), lambda i, k: (i, 0)),    # alpha*h0     -- resident per row tile
            pl.BlockSpec((f, f), lambda i, k: (0, 0)),     # W'           -- resident
        ],
        out_specs=pl.BlockSpec((tm, f), lambda i, k: (i, 0)),
        scratch_shapes=[pltpu.VMEM((tm, f), jnp.float32)],
        compiler_params=pltpu.CompilerParams(
            dimension_semantics=("parallel", "arbitrary"),
            vmem_limit_bytes=_VMEM_LIMIT,
        ),
    )(adj_s, h_bf16, h, h0_s, w_prime)


def deep_gcn_forward(x, adj, params, *, lamda, alpha):
    # F.dropout(..., training=False) == identity (inference mode).
    n, nfeat = x.shape
    nhidden = params["fc_in_w"].shape[1]
    nclass = params["fc_out_w"].shape[1]

    # Pad to lane/sublane-dense shapes (multiples of 128). Zero-padded weights/bias keep the
    # padded feature columns exactly zero, and zero-padded adj columns keep padded nodes from
    # leaking into real rows, so this is exact; output is sliced at the end.
    n_p = _round_up(n, 128)
    fi_p = _round_up(nfeat, 128)
    fh_p = _round_up(nhidden, 128)
    fo_p = _round_up(nclass, 128)

    x_p = _pad2(x.astype(jnp.float32), n_p, fi_p)
    adj_p = _pad2(adj.astype(jnp.float32), n_p, n_p)
    w_in = _pad2(params["fc_in_w"], fi_p, fh_p)
    b_in = _pad1(params["fc_in_b"], fh_p)
    w_out = _pad2(params["fc_out_w"], fh_p, fo_p)
    b_out = _pad1(params["fc_out_b"], fo_p)

    # One-time folds, amortized over all layers.
    adj_s = ((1.0 - alpha) * adj_p).astype(jnp.bfloat16)

    h = linear(x_p, w_in, b_in, relu=True)     # fcs[0] + ReLU
    h0_s = alpha * h                           # _layers[0], pre-scaled
    eye = jnp.eye(fh_p, dtype=jnp.float32)

    for i, w in enumerate(params["conv_ws"]):
        theta = min(1.0, math.log(lamda / (i + 1) + 1.0))
        w_p = _pad2(w, fh_p, fh_p)
        w_prime = (theta * w_p + (1.0 - theta) * eye).astype(jnp.bfloat16)
        h = gcn_layer(h, adj_s, h0_s, w_prime)

    out = linear(h, w_out, b_out, relu=False)  # fcs[-1]
    return out[:n, :nclass]


# --------------------------- pure-JAX reference ------------------------------

def deep_gcn_reference(x, adj, params, *, lamda, alpha):
    h = jnp.maximum(x @ params["fc_in_w"] + params["fc_in_b"], 0.0)
    h0 = h
    for i, w in enumerate(params["conv_ws"]):
        theta = min(1.0, math.log(lamda / (i + 1) + 1.0))
        hi = adj @ h
        support = (1.0 - alpha) * hi + alpha * h0
        out = theta * (support @ w) + (1.0 - theta) * support + h   # residual=True
        h = jnp.maximum(out, 0.0)
    return h @ params["fc_out_w"] + params["fc_out_b"]


# ---------------------------- parameter setup --------------------------------

def init_params(key, nlayers, nfeat, nhidden, nclass):
    keys = jax.random.split(key, nlayers + 4)
    stdv_c = 1.0 / math.sqrt(nhidden)          # GraphConvolution.reset_parameters
    conv_ws = [
        jax.random.uniform(keys[i], (nhidden, nhidden), jnp.float32, -stdv_c, stdv_c)
        for i in range(nlayers)
    ]
    s_in = 1.0 / math.sqrt(nfeat)              # nn.Linear default init
    s_out = 1.0 / math.sqrt(nhidden)
    return {
        "conv_ws": conv_ws,
        "fc_in_w": jax.random.uniform(keys[nlayers + 0], (nfeat, nhidden),
                                      jnp.float32, -s_in, s_in),
        "fc_in_b": jax.random.uniform(keys[nlayers + 1], (nhidden,),
                                      jnp.float32, -s_in, s_in),
        "fc_out_w": jax.random.uniform(keys[nlayers + 2], (nhidden, nclass),
                                       jnp.float32, -s_out, s_out),
        "fc_out_b": jax.random.uniform(keys[nlayers + 3], (nclass,),
                                       jnp.float32, -s_out, s_out),
    }


if __name__ == "__main__":
    N, NFEAT, NHIDDEN, NCLASS = 256, 64, 128, 8
    NLAYERS, LAMDA, ALPHA = 4, 0.5, 0.1

    key = jax.random.PRNGKey(0)
    kx, ka, kp = jax.random.split(key, 3)

    x = jax.random.normal(kx, (N, NFEAT), jnp.float32)

    # Symmetric, row-normalized dense adjacency (stand-in for the spmm operand).
    a = jax.random.uniform(ka, (N, N), jnp.float32)
    a = (a + a.T) * 0.5 + jnp.eye(N, dtype=jnp.float32)
    adj = a / jnp.sum(a, axis=1, keepdims=True)

    params = init_params(kp, NLAYERS, NFEAT, NHIDDEN, NCLASS)

    out = deep_gcn_forward(x, adj, params, lamda=LAMDA, alpha=ALPHA)
    out = jax.block_until_ready(out)

    ref = deep_gcn_reference(x, adj, params, lamda=LAMDA, alpha=ALPHA)
    assert out.shape == (N, NCLASS) and out.dtype == jnp.float32
    assert jnp.allclose(out, ref, rtol=5e-2, atol=5e-2), "mismatch vs f32 reference"
    print("KERNEL_OK")
</pallas_src>

<mosaic_0001>
module attributes {stable_mosaic.version = 11 : i64} {
  func.func @linear_kernel(%arg0: i32, %arg1: memref<256x128xf32, #tpu.memory_space<vmem>>, %arg2: memref<128x128xf32, #tpu.memory_space<vmem>>, %arg3: memref<1x128xf32, #tpu.memory_space<vmem>>, %arg4: memref<256x128xf32, #tpu.memory_space<vmem>>) attributes {dimension_semantics = [#tpu.dimension_semantics<parallel>], iteration_bounds = array<i64: 1>, scalar_prefetch = 0 : i64, scratch_operands = 0 : i64, tpu.core_type = #tpu.core_type<tc>, window_params = [{transform_indices = @transform_0, window_bounds = array<i64: 256, 128>}, {pipeline_mode = #tpu.pipeline_mode<synchronous>, transform_indices = @transform_1, window_bounds = array<i64: 128, 128>}, {pipeline_mode = #tpu.pipeline_mode<synchronous>, transform_indices = @transform_2, window_bounds = array<i64: 1, 128>}, {transform_indices = @transform_3, window_bounds = array<i64: 256, 128>}]} {
    %c0 = arith.constant 0 : index
    %c0_0 = arith.constant 0 : index
    %0 = vector.load %arg1[%c0, %c0_0] : memref<256x128xf32, #tpu.memory_space<vmem>>, vector<256x128xf32>
    %c0_1 = arith.constant 0 : index
    %c0_2 = arith.constant 0 : index
    %1 = vector.load %arg2[%c0_1, %c0_2] : memref<128x128xf32, #tpu.memory_space<vmem>>, vector<128x128xf32>
    %cst = arith.constant dense<0.000000e+00> : vector<256x128xf32>
    %2 = tpu.matmul %0, %1, %cst {dimension_numbers = #tpu.dot_dimension_numbers<[1], [0], [0], [1], [0, 0, 1, 1], [], []>} : vector<256x128xf32>, vector<128x128xf32>, vector<256x128xf32> -> vector<256x128xf32>
    %c0_3 = arith.constant 0 : index
    %c0_4 = arith.constant 0 : index
    %3 = vector.load %arg3[%c0_3, %c0_4] : memref<1x128xf32, #tpu.memory_space<vmem>>, vector<1x128xf32>
    %4 = vector.broadcast %3 : vector<1x128xf32> to vector<256x128xf32>
    %5 = arith.addf %2, %4 : vector<256x128xf32>
    %cst_5 = arith.constant 0.000000e+00 : f32
    %6 = vector.broadcast %cst_5 : f32 to vector<256x128xf32>
    %7 = arith.maximumf %5, %6 : vector<256x128xf32>
    %c0_6 = arith.constant 0 : index
    %c0_7 = arith.constant 0 : index
    %8 = vector.load %arg4[%c0_6, %c0_7] : memref<256x128xf32, #tpu.memory_space<vmem>>, vector<256x128xf32>
    tpu.vector_store %arg4[%c0_6, %c0_7], %7 {strides = array<i32>} : memref<256x128xf32, #tpu.memory_space<vmem>>, vector<256x128xf32>,
    return
  }
  func.func @transform_0(%arg0: i32) -> (i32, i32) {
    %c0_i32 = arith.constant 0 : i32
    %c0_i32_0 = arith.constant 0 : i32
    return %arg0, %c0_i32 : i32, i32
  }
  func.func @transform_1(%arg0: i32) -> (i32, i32) {
    %c0_i32 = arith.constant 0 : i32
    %c0_i32_0 = arith.constant 0 : i32
    %c0_i32_1 = arith.constant 0 : i32
    return %c0_i32, %c0_i32_0 : i32, i32
  }
  func.func @transform_2(%arg0: i32) -> (i32, i32) {
    %c0_i32 = arith.constant 0 : i32
    %c0_i32_0 = arith.constant 0 : i32
    %c0_i32_1 = arith.constant 0 : i32
    return %c0_i32, %c0_i32_0 : i32, i32
  }
  func.func @transform_3(%arg0: i32) -> (i32, i32) {
    %c0_i32 = arith.constant 0 : i32
    %c0_i32_0 = arith.constant 0 : i32
    return %arg0, %c0_i32 : i32, i32
  }
}

</mosaic_0001>

<bundles_post_ra>
// kernel: tpu_custom_call.1
= control target key start
LH: loop header
LB: loop body
LE: loop exit
PB: predicated region body
PF: predicated region fallthrough
CT: control target
= control target key end

     0   :  { %8 = vsyncpa [#allocation3], 0  ;;  %s766_s0 = inlined_call_operand.hbm [shape: f32[256,128], index: 0, kind: input, shape index: {}]   ;;  %s767_s1 = inlined_call_operand.hbm [shape: f32[128,128], index: 1, kind: input, shape index: {}]   ;;  %s768_s2 = inlined_call_operand.vmem [shape: f32[1,128], index: 2, kind: input, shape index: {}]   ;;  %s769_s3 = inlined_call_operand.hbm [shape: f32[256,128], index: 3, kind: output, shape index: {}]  }
   0x1   :  { %9 = vsyncpa [#allocation6], 0 }
   0x2   :  { %10 = vsyncpa [#allocation4], 0  ;;  %s659_s12 = smov [#allocation2]   ;;  %s587_s16 = scalar_lea.hbm %s766_s0, 4096 }
   0x3   :  { %s16_s13 = sshll.u32 %s659_s12, 4  ;;  %p588_p0 = scmp.ne.s32.totalorder %s766_s0, %s587_s16  ;;  %s17_s13 = int_to_ptr.vmem [resolvable:$true] %s16_s13 }
   0x4   :  { %p591_p1 = scmp.lt.u32.totalorder %s587_s16, %s766_s0 }
   0x6   :  { %p593_p2 = pnand %p591_p1, %p588_p0 }
   0x8   :  { %596 = shalt.err (!%p593_p2)
}
   0x9   :  { %s597_s21 = scalar_lea.vmem %s17_s13, 4096  ;;  %p602_p4 = scmp.lt.s32.totalorder %s17_s13, %s17_s13 }
   0xa   :  { %p598_p3 = scmp.ne.s32.totalorder %s17_s13, %s597_s21  ;;  %p603_p5 = scmp.lt.s32.totalorder %s597_s21, %s597_s21 }
   0xc   :  { %p604_p6 = por %p603_p5, %p602_p4 }
   0xe   :  { %p605_p7 = pnand %p604_p6, %p598_p3 }
  0x10   :  { %608 = shalt.err (!%p605_p7)
}
  0x11   :  { %s660_s22 = smov 128   ;;  %s661_s23 = smov 8  }
  0x12   :  { %22 = dma.hbm_to_vmem [thread:$0]  %s766_s0, 4096, %s17_s13, [#allocation3], %s660_s22, %s660_s22, %s661_s23  }
  0x13   :  { %s662_s26 = smov [#allocation5]   ;;  %s609_s30 = scalar_lea.hbm %s767_s1, 2048 }
  0x14   :  { %s28_s27 = sshll.u32 %s662_s26, 4  ;;  %p610_p8 = scmp.ne.s32.totalorder %s767_s1, %s609_s30  ;;  %s29_s27 = int_to_ptr.vmem [resolvable:$true] %s28_s27 }
  0x15   :  { %p613_p9 = scmp.lt.u32.totalorder %s609_s30, %s767_s1 }
  0x17   :  { %p615_p10 = pnand %p613_p9, %p610_p8 }
  0x19   :  { %618 = shalt.err (!%p615_p10)
}
  0x1a   :  { %s619_s8 = scalar_lea.vmem %s29_s27, 2048  ;;  %p624_p12 = scmp.lt.s32.totalorder %s29_s27, %s29_s27 }
  0x1b   :  { %p620_p11 = scmp.ne.s32.totalorder %s29_s27, %s619_s8  ;;  %p625_p13 = scmp.lt.s32.totalorder %s619_s8, %s619_s8 }
  0x1d   :  { %p626_p0 = por %p625_p13, %p624_p12 }
  0x1f   :  { %p627_p1 = pnand %p626_p0, %p620_p11 }
  0x21   :  { %630 = shalt.err (!%p627_p1)
}
  0x22   :  { %34 = dma.hbm_to_vmem [thread:$0]  %s767_s1, 2048, %s29_s27, [#allocation6], %s660_s22, %s660_s22, %s661_s23  }
  0x23   :  { %653 = dma.done.wait [#allocation3], 4096  }
  0x24   :  { %654 = vsyncadd [#allocation3], 4294963200 }
  0x25   :  { %655 = dma.done.wait [#allocation6], 2048  }
  0x26   :  { %656 = vsyncadd [#allocation6], 4294965248  ;;  %v75_v0 = vld [vmem:[#allocation5] sm:$0xff]  ;;  %v76_v1 = vld [vmem:[#allocation5 + $0x8] sm:$0xff] }
  0x27   :  { %v77_v2 = vld [vmem:[#allocation5 + $0x10] sm:$0xff]  ;;  %v534_v3 = vpack.c.bf16 %v76_v1, %v75_v0  ;;  %v78_v4 = vld [vmem:[#allocation5 + $0x18] sm:$0xff]  ;;  %v79_v6 = vld [vmem:[#allocation5 + $0x20] sm:$0xff] }
  0x28   :  { %v538_v5 = vpack.c.bf16 %v78_v4, %v77_v2  ;;  %v80_v7 = vld [vmem:[#allocation5 + $0x28] sm:$0xff]  ;;  %v43_v9 = vld [vmem:[#allocation2] sm:$0xff]  ;;  %v81_v11 = vld [vmem:[#allocation5 + $0x30] sm:$0xff] }
  0x29   :  { %535 = vmatprep.subr.bf16.mxu0 %v534_v3  ;;  %566 = vmatprep.subr.bf16.mxu1 %v534_v3  ;;  %v542_v8 = vpack.c.bf16 %v80_v7, %v79_v6  ;;  %v59_v10 = vld [vmem:[#allocation2 + $0x80] sm:$0xff]  ;;  %v82_v12 = vld [vmem:[#allocation5 + $0x38] sm:$0xff]  ;;  %v84_v15 = vld [vmem:[#allocation5 + $0x48] sm:$0xff] }
  0x2a   :  { %537 = vmatpush3.bf16.msra.mxu0 %v534_v3  ;;  %574 = vmatpush3.bf16.msra.mxu1 %v534_v3  ;;  %v546_v13 = vpack.c.bf16 %v82_v12, %v81_v11  ;;  %v83_v14 = vld [vmem:[#allocation5 + $0x40] sm:$0xff]  ;;  %v85_v17 = vld [vmem:[#allocation5 + $0x50] sm:$0xff]  ;;  %v86_v18 = vld [vmem:[#allocation5 + $0x58] sm:$0xff] }
  0x2b   :  { %539 = vmatprep.subr.bf16.mxu0 %v538_v5  ;;  %567 = vmatprep.subr.bf16.mxu1 %v538_v5  ;;  %v550_v16 = vpack.c.bf16 %v84_v15, %v83_v14  ;;  %v554_v19 = vpack.c.bf16 %v86_v18, %v85_v17  ;;  %v87_v20 = vld [vmem:[#allocation5 + $0x60] sm:$0xff]  ;;  %v88_v21 = vld [vmem:[#allocation5 + $0x68] sm:$0xff]  ;;  %v89_v23 = vld [vmem:[#allocation5 + $0x70] sm:$0xff] }
  0x2c   :  { %486 = vmatprep.mubr.f32.mxu0 %v43_v9  ;;  %510 = vmatprep.mubr.f32.mxu1 %v59_v10  ;;  %v558_v22 = vpack.c.bf16 %v88_v21, %v87_v20  ;;  %v90_v24 = vld [vmem:[#allocation5 + $0x78] sm:$0xff]  ;;  %v44_v26 = vld [vmem:[#allocation2 + $0x8] sm:$0xff]  ;;  %v45_v28 = vld [vmem:[#allocation2 + $0x10] sm:$0xff] }
  0x2d   :  { %v562_v25 = vpack.c.bf16 %v90_v24, %v89_v23  ;;  %v60_v27 = vld [vmem:[#allocation2 + $0x88] sm:$0xff]  ;;  %v61_v29 = vld [vmem:[#allocation2 + $0x90] sm:$0xff]  ;;  %v46_v30 = vld [vmem:[#allocation2 + $0x18] sm:$0xff] }
  0x2e   :  { %541 = vmatpush3.bf16.msra.mxu0 %v538_v5  ;;  %575 = vmatpush3.bf16.msra.mxu1 %v538_v5  ;;  %v62_v31 = vld [vmem:[#allocation2 + $0x98] sm:$0xff]  ;;  %v47_v32 = vld [vmem:[#allocation2 + $0x20] sm:$0xff]  ;;  %v48_v34 = vld [vmem:[#allocation2 + $0x28] sm:$0xff] }
  0x2f   :  { %543 = vmatprep.subr.bf16.mxu0 %v542_v8  ;;  %568 = vmatprep.subr.bf16.mxu1 %v542_v8  ;;  %v63_v33 = vld [vmem:[#allocation2 + $0xa0] sm:$0xff]  ;;  %v64_v35 = vld [vmem:[#allocation2 + $0xa8] sm:$0xff]  ;;  %v49_v36 = vld [vmem:[#allocation2 + $0x30] sm:$0xff] }
  0x30   :  { %v65_v37 = vld [vmem:[#allocation2 + $0xb0] sm:$0xff]  ;;  %v50_v38 = vld [vmem:[#allocation2 + $0x38] sm:$0xff]  ;;  %v51_v40 = vld [vmem:[#allocation2 + $0x40] sm:$0xff] }
  0x31   :  { %v66_v39 = vld [vmem:[#allocation2 + $0xb8] sm:$0xff]  ;;  %v67_v41 = vld [vmem:[#allocation2 + $0xc0] sm:$0xff]  ;;  %v52_v42 = vld [vmem:[#allocation2 + $0x48] sm:$0xff] }
  0x32   :  { %545 = vmatpush3.bf16.msra.mxu0 %v542_v8  ;;  %576 = vmatpush3.bf16.msra.mxu1 %v542_v8  ;;  %v68_v43 = vld [vmem:[#allocation2 + $0xc8] sm:$0xff]  ;;  %v53_v44 = vld [vmem:[#allocation2 + $0x50] sm:$0xff]  ;;  %v54_v46 = vld [vmem:[#allocation2 + $0x58] sm:$0xff] }
  0x33   :  { %547 = vmatprep.subr.bf16.mxu0 %v546_v13  ;;  %569 = vmatprep.subr.bf16.mxu1 %v546_v13  ;;  %v69_v45 = vld [vmem:[#allocation2 + $0xd0] sm:$0xff]  ;;  %v70_v47 = vld [vmem:[#allocation2 + $0xd8] sm:$0xff]  ;;  %v55_v48 = vld [vmem:[#allocation2 + $0x60] sm:$0xff] }
  0x34   :  { %v71_v49 = vld [vmem:[#allocation2 + $0xe0] sm:$0xff]  ;;  %v56_v50 = vld [vmem:[#allocation2 + $0x68] sm:$0xff]  ;;  %v57_v52 = vld [vmem:[#allocation2 + $0x70] sm:$0xff] }
  0x35   :  { %v72_v51 = vld [vmem:[#allocation2 + $0xe8] sm:$0xff]  ;;  %v73_v53 = vld [vmem:[#allocation2 + $0xf0] sm:$0xff]  ;;  %v58_v54 = vld [vmem:[#allocation2 + $0x78] sm:$0xff] }
  0x36   :  { %549 = vmatpush3.bf16.msra.mxu0 %v546_v13  ;;  %577 = vmatpush3.bf16.msra.mxu1 %v546_v13  ;;  %v74_v55 = vld [vmem:[#allocation2 + $0xf8] sm:$0xff]  ;;  %v717_v56 = vld [vmem:[%s768_s2] ss:$0 sm:$0xff]  ;;  %s663_s2 = smov [#allocation7]  }
  0x37   :  { %551 = vmatprep.subr.bf16.mxu0 %v550_v16  ;;  %570 = vmatprep.subr.bf16.mxu1 %v550_v16  ;;  %s392_s11 = sshll.u32 %s663_s2, 4  ;;  %s393_s11 = int_to_ptr.vmem [resolvable:$true] %s392_s11 }
  0x38   :  { %s631_s12 = scalar_lea.vmem %s393_s11, 4096  ;;  %p636_p3 = scmp.lt.s32.totalorder %s393_s11, %s393_s11 }
  0x39   :  { %p632_p2 = scmp.ne.s32.totalorder %s393_s11, %s631_s12  ;;  %p637_p4 = scmp.lt.s32.totalorder %s631_s12, %s631_s12 }
  0x3a   :  { %553 = vmatpush3.bf16.msra.mxu0 %v550_v16  ;;  %578 = vmatpush3.bf16.msra.mxu1 %v550_v16 }
  0x3b   :  { %555 = vmatprep.subr.bf16.mxu0 %v554_v19  ;;  %571 = vmatprep.subr.bf16.mxu1 %v554_v19  ;;  %p638_p5 = por %p637_p4, %p636_p3 }
  0x3d   :  { %p639_p6 = pnand %p638_p5, %p632_p2 }
  0x3e   :  { %557 = vmatpush3.bf16.msra.mxu0 %v554_v19  ;;  %579 = vmatpush3.bf16.msra.mxu1 %v554_v19 }
  0x3f   :  { %559 = vmatprep.subr.bf16.mxu0 %v558_v22  ;;  %572 = vmatprep.subr.bf16.mxu1 %v558_v22 }
  0x42   :  { %561 = vmatpush3.bf16.msra.mxu0 %v558_v22  ;;  %580 = vmatpush3.bf16.msra.mxu1 %v558_v22 }
  0x43   :  { %563 = vmatprep.subr.bf16.mxu0 %v562_v25  ;;  %573 = vmatprep.subr.bf16.mxu1 %v562_v25 }
  0x46   :  { %565 = vmatpush3.bf16.msra.mxu0 %v562_v25  ;;  %581 = vmatpush3.bf16.msra.mxu1 %v562_v25 }
  0x49   :  { %487 = vmatmul.mubr.f32.vlgmr.msra.gmra.mrb[0].mxu0 %v44_v26  ;;  %511 = vmatmul.mubr.f32.vlgmr.msra.gmra.mrb[0].mxu1 %v60_v27 }
  0x4a   :  { %489 = vmatprep.mubr.f32.mxu0 %v45_v28  ;;  %513 = vmatprep.mubr.f32.mxu1 %v61_v29 }
  0x4d   :  { %490 = vmatmul.mubr.f32.gmra.mrb[2].mxu0 %v46_v30  ;;  %514 = vmatmul.mubr.f32.gmra.mrb[2].mxu1 %v62_v31 }
  0x4e   :  { %492 = vmatprep.mubr.f32.mxu0 %v47_v32  ;;  %516 = vmatprep.mubr.f32.mxu1 %v63_v33 }
  0x51   :  { %493 = vmatmul.mubr.f32.gmra.mrb[4].mxu0 %v48_v34  ;;  %517 = vmatmul.mubr.f32.gmra.mrb[4].mxu1 %v64_v35 }
  0x52   :  { %495 = vmatprep.mubr.f32.mxu0 %v49_v36  ;;  %519 = vmatprep.mubr.f32.mxu1 %v65_v37 }
  0x55   :  { %496 = vmatmul.mubr.f32.gmra.mrb[6].mxu0 %v50_v38  ;;  %520 = vmatmul.mubr.f32.gmra.mrb[6].mxu1 %v66_v39 }
  0x56   :  { %498 = vmatprep.mubr.f32.mxu0 %v51_v40  ;;  %522 = vmatprep.mubr.f32.mxu1 %v67_v41 }
  0x59   :  { %499 = vmatmul.mubr.f32.gmra.mrb[8].mxu0 %v52_v42  ;;  %523 = vmatmul.mubr.f32.gmra.mrb[8].mxu1 %v68_v43 }
  0x5a   :  { %501 = vmatprep.mubr.f32.mxu0 %v53_v44  ;;  %525 = vmatprep.mubr.f32.mxu1 %v69_v45 }
  0x5d   :  { %502 = vmatmul.mubr.f32.gmra.mrb[10].mxu0 %v54_v46  ;;  %526 = vmatmul.mubr.f32.gmra.mrb[10].mxu1 %v70_v47 }
  0x5e   :  { %504 = vmatprep.mubr.f32.mxu0 %v55_v48  ;;  %528 = vmatprep.mubr.f32.mxu1 %v71_v49 }
  0x61   :  { %505 = vmatmul.mubr.f32.gmra.mrb[12].mxu0 %v56_v50  ;;  %529 = vmatmul.mubr.f32.gmra.mrb[12].mxu1 %v72_v51 }
  0x62   :  { %507 = vmatprep.mubr.f32.mxu0 %v57_v52  ;;  %531 = vmatprep.mubr.f32.mxu1 %v73_v53 }
  0x65   :  { %508 = vmatmul.mubr.f32.gmra.mrb[14].mxu0 %v58_v54  ;;  %532 = vmatmul.mubr.f32.gmra.mrb[14].mxu1 %v74_v55 }
 0x11c   :  { %v488_v57 = vpop.f32.mrb[0].mxu0  ;;  %v512_v58 = vpop.f32.mrb[0].mxu1 }
 0x11d   :  { %v170_v59 = vadd.f32 %v488_v57, %v717_v56  ;;  %v250_v60 = vadd.f32 %v512_v58, %v717_v56  ;;  %v164_v61 = vpop.f32.mrb[1].mxu0  ;;  %v244_v62 = vpop.f32.mrb[1].mxu1 }
 0x11e   :  { %v165_v63 = vadd.f32 %v717_v56, %v164_v61  ;;  %v245_v0 = vadd.f32 %v717_v56, %v244_v62 }
 0x11f   :  { %v324_v1 = vmax.f32 %v170_v59, 0.0  ;;  %v340_v2 = vmax.f32 %v250_v60, 0.0 }
 0x120   :  { %v323_v3 = vmax.f32 %v165_v63, 0.0  ;;  %v339_v4 = vmax.f32 %v245_v0, 0.0  ;;  %v491_v5 = vpop.f32.mrb[2].mxu0  ;;  %v515_v6 = vpop.f32.mrb[2].mxu1 }
 0x121   :  { %356 = vst [vmem:[#allocation7 + $0x8] sm:$0xff] %v324_v1  ;;  %372 = vst [vmem:[#allocation7 + $0x88] sm:$0xff] %v340_v2  ;;  %v180_v7 = vadd.f32 %v491_v5, %v717_v56  ;;  %v260_v8 = vadd.f32 %v515_v6, %v717_v56  ;;  %v174_v9 = vpop.f32.mrb[3].mxu0  ;;  %v254_v10 = vpop.f32.mrb[3].mxu1 }
 0x122   :  { %355 = vst [vmem:[#allocation7] sm:$0xff] %v323_v3  ;;  %371 = vst [vmem:[#allocation7 + $0x80] sm:$0xff] %v339_v4  ;;  %v175_v11 = vadd.f32 %v717_v56, %v174_v9  ;;  %v255_v12 = vadd.f32 %v717_v56, %v254_v10 }
 0x123   :  { %v326_v13 = vmax.f32 %v180_v7, 0.0  ;;  %v342_v14 = vmax.f32 %v260_v8, 0.0 }
 0x124   :  { %v325_v15 = vmax.f32 %v175_v11, 0.0  ;;  %v341_v16 = vmax.f32 %v255_v12, 0.0  ;;  %v494_v17 = vpop.f32.mrb[4].mxu0  ;;  %v518_v18 = vpop.f32.mrb[4].mxu1 }
 0x125   :  { %358 = vst [vmem:[#allocation7 + $0x18] sm:$0xff] %v326_v13  ;;  %374 = vst [vmem:[#allocation7 + $0x98] sm:$0xff] %v342_v14  ;;  %v190_v19 = vadd.f32 %v494_v17, %v717_v56  ;;  %v270_v20 = vadd.f32 %v518_v18, %v717_v56  ;;  %v184_v21 = vpop.f32.mrb[5].mxu0  ;;  %v264_v22 = vpop.f32.mrb[5].mxu1 }
 0x126   :  { %357 = vst [vmem:[#allocation7 + $0x10] sm:$0xff] %v325_v15  ;;  %373 = vst [vmem:[#allocation7 + $0x90] sm:$0xff] %v341_v16  ;;  %v185_v23 = vadd.f32 %v717_v56, %v184_v21  ;;  %v265_v24 = vadd.f32 %v717_v56, %v264_v22 }
 0x127   :  { %v328_v25 = vmax.f32 %v190_v19, 0.0  ;;  %v344_v26 = vmax.f32 %v270_v20, 0.0 }
 0x128   :  { %v327_v27 = vmax.f32 %v185_v23, 0.0  ;;  %v343_v28 = vmax.f32 %v265_v24, 0.0  ;;  %v497_v29 = vpop.f32.mrb[6].mxu0  ;;  %v521_v30 = vpop.f32.mrb[6].mxu1 }
 0x129   :  { %360 = vst [vmem:[#allocation7 + $0x28] sm:$0xff] %v328_v25  ;;  %376 = vst [vmem:[#allocation7 + $0xa8] sm:$0xff] %v344_v26  ;;  %v200_v31 = vadd.f32 %v497_v29, %v717_v56  ;;  %v280_v32 = vadd.f32 %v521_v30, %v717_v56  ;;  %v194_v33 = vpop.f32.mrb[7].mxu0  ;;  %v274_v34 = vpop.f32.mrb[7].mxu1 }
 0x12a   :  { %359 = vst [vmem:[#allocation7 + $0x20] sm:$0xff] %v327_v27  ;;  %375 = vst [vmem:[#allocation7 + $0xa0] sm:$0xff] %v343_v28  ;;  %v195_v35 = vadd.f32 %v717_v56, %v194_v33  ;;  %v275_v36 = vadd.f32 %v717_v56, %v274_v34 }
 0x12b   :  { %v330_v37 = vmax.f32 %v200_v31, 0.0  ;;  %v346_v38 = vmax.f32 %v280_v32, 0.0 }
 0x12c   :  { %v329_v39 = vmax.f32 %v195_v35, 0.0  ;;  %v345_v40 = vmax.f32 %v275_v36, 0.0  ;;  %v500_v41 = vpop.f32.mrb[8].mxu0  ;;  %v524_v42 = vpop.f32.mrb[8].mxu1 }
 0x12d   :  { %362 = vst [vmem:[#allocation7 + $0x38] sm:$0xff] %v330_v37  ;;  %378 = vst [vmem:[#allocation7 + $0xb8] sm:$0xff] %v346_v38  ;;  %v210_v43 = vadd.f32 %v500_v41, %v717_v56  ;;  %v290_v44 = vadd.f32 %v524_v42, %v717_v56  ;;  %v204_v45 = vpop.f32.mrb[9].mxu0  ;;  %v284_v46 = vpop.f32.mrb[9].mxu1 }
 0x12e   :  { %361 = vst [vmem:[#allocation7 + $0x30] sm:$0xff] %v329_v39  ;;  %377 = vst [vmem:[#allocation7 + $0xb0] sm:$0xff] %v345_v40  ;;  %v205_v47 = vadd.f32 %v717_v56, %v204_v45  ;;  %v285_v48 = vadd.f32 %v717_v56, %v284_v46 }
 0x12f   :  { %v332_v49 = vmax.f32 %v210_v43, 0.0  ;;  %v348_v50 = vmax.f32 %v290_v44, 0.0 }
 0x130   :  { %v331_v51 = vmax.f32 %v205_v47, 0.0  ;;  %v347_v52 = vmax.f32 %v285_v48, 0.0  ;;  %v503_v53 = vpop.f32.mrb[10].mxu0  ;;  %v527_v54 = vpop.f32.mrb[10].mxu1 }
 0x131   :  { %364 = vst [vmem:[#allocation7 + $0x48] sm:$0xff] %v332_v49  ;;  %380 = vst [vmem:[#allocation7 + $0xc8] sm:$0xff] %v348_v50  ;;  %v220_v55 = vadd.f32 %v503_v53, %v717_v56  ;;  %v300_v57 = vadd.f32 %v527_v54, %v717_v56  ;;  %v214_v58 = vpop.f32.mrb[11].mxu0  ;;  %v294_v59 = vpop.f32.mrb[11].mxu1 }
 0x132   :  { %363 = vst [vmem:[#allocation7 + $0x40] sm:$0xff] %v331_v51  ;;  %379 = vst [vmem:[#allocation7 + $0xc0] sm:$0xff] %v347_v52  ;;  %v215_v60 = vadd.f32 %v717_v56, %v214_v58  ;;  %v295_v61 = vadd.f32 %v717_v56, %v294_v59 }
 0x133   :  { %v334_v62 = vmax.f32 %v220_v55, 0.0  ;;  %v350_v63 = vmax.f32 %v300_v57, 0.0 }
 0x134   :  { %v333_v0 = vmax.f32 %v215_v60, 0.0  ;;  %v349_v1 = vmax.f32 %v295_v61, 0.0  ;;  %v506_v2 = vpop.f32.mrb[12].mxu0  ;;  %v530_v3 = vpop.f32.mrb[12].mxu1 }
 0x135   :  { %366 = vst [vmem:[#allocation7 + $0x58] sm:$0xff] %v334_v62  ;;  %382 = vst [vmem:[#allocation7 + $0xd8] sm:$0xff] %v350_v63  ;;  %v230_v4 = vadd.f32 %v506_v2, %v717_v56  ;;  %v310_v5 = vadd.f32 %v530_v3, %v717_v56  ;;  %v224_v6 = vpop.f32.mrb[13].mxu0  ;;  %v304_v7 = vpop.f32.mrb[13].mxu1 }
 0x136   :  { %365 = vst [vmem:[#allocation7 + $0x50] sm:$0xff] %v333_v0  ;;  %381 = vst [vmem:[#allocation7 + $0xd0] sm:$0xff] %v349_v1  ;;  %v225_v8 = vadd.f32 %v717_v56, %v224_v6  ;;  %v305_v9 = vadd.f32 %v717_v56, %v304_v7 }
 0x137   :  { %v336_v10 = vmax.f32 %v230_v4, 0.0  ;;  %v352_v11 = vmax.f32 %v310_v5, 0.0 }
 0x138   :  { %v335_v12 = vmax.f32 %v225_v8, 0.0  ;;  %v351_v13 = vmax.f32 %v305_v9, 0.0  ;;  %v509_v14 = vpop.f32.mrb[14].mxu0  ;;  %v533_v15 = vpop.f32.mrb[14].mxu1 }
 0x139   :  { %368 = vst [vmem:[#allocation7 + $0x68] sm:$0xff] %v336_v10  ;;  %384 = vst [vmem:[#allocation7 + $0xe8] sm:$0xff] %v352_v11  ;;  %v240_v16 = vadd.f32 %v509_v14, %v717_v56  ;;  %v320_v17 = vadd.f32 %v533_v15, %v717_v56  ;;  %v234_v18 = vpop.f32.mrb[15].mxu0  ;;  %v314_v19 = vpop.f32.mrb[15].mxu1 }
 0x13a   :  { %367 = vst [vmem:[#allocation7 + $0x60] sm:$0xff] %v335_v12  ;;  %383 = vst [vmem:[#allocation7 + $0xe0] sm:$0xff] %v351_v13  ;;  %v235_v20 = vadd.f32 %v717_v56, %v234_v18  ;;  %v315_v21 = vadd.f32 %v717_v56, %v314_v19 }
 0x13b   :  { %v338_v22 = vmax.f32 %v240_v16, 0.0  ;;  %v354_v23 = vmax.f32 %v320_v17, 0.0 }
 0x13c   :  { %v337_v24 = vmax.f32 %v235_v20, 0.0  ;;  %v353_v25 = vmax.f32 %v315_v21, 0.0 }
 0x13d   :  { %370 = vst [vmem:[#allocation7 + $0x78] sm:$0xff] %v338_v22  ;;  %386 = vst [vmem:[#allocation7 + $0xf8] sm:$0xff] %v354_v23 }
 0x13e   :  { %369 = vst [vmem:[#allocation7 + $0x70] sm:$0xff] %v337_v24  ;;  %385 = vst [vmem:[#allocation7 + $0xf0] sm:$0xff] %v353_v25 }
 0x13f   :  { %642 = shalt.err (!%p639_p6)
}
 0x140   :  { %s643_s15 = scalar_lea.hbm %s769_s3, 4096 }
 0x141   :  { %p644_p7 = scmp.ne.s32.totalorder %s769_s3, %s643_s15  ;;  %p647_p8 = scmp.lt.u32.totalorder %s643_s15, %s769_s3 }
 0x143   :  { %p649_p9 = pnand %p647_p8, %p644_p7 }
 0x145   :  { %652 = shalt.err (!%p649_p9)
}
 0x146   :  { %398 = dma.vmem_to_hbm [thread:$0]  %s393_s11, 4096, %s769_s3, [#allocation4], %s660_s22, %s660_s22, %s661_s23  }
 0x147   :  { %657 = dma.done.wait [#allocation4], 4096  }
 0x148   :  { %658 = vsyncadd [#allocation4], 4294963200 }
 0x149   :  { %402 = vsyncpa [#allocation3], 1 }
 0x14a   :  { %403 = vsyncpa [#allocation6], 1 }
 0x14b   :  { %404 = vsyncpa [#allocation4], 1 }

</bundles_post_ra>
